<compile_context>
chip_gen: v7x
topology: tpu7x:2x2x1
jax: 0.10.0
libtpu: 0.0.40
codegen_flags: <defaults>
</compile_context>

<pallas_src>
import jax
import jax.numpy as jnp
from jax.experimental import pallas as pl
from jax.experimental.pallas import tpu as pltpu

# Lane-dense layout constants.
_LANES = 1024          # multiple of 128 -> unmasked vst
_MAX_ROWS_PER_TILE = 512  # 512 x 1024 f32 tile = 2 MiB; double-buffered in+out ~ 8 MiB
_TINY_THRESHOLD = 1024    # below ~one tile row-group, fused XLA add beats a kernel launch


def _add_one_kernel(x_ref, o_ref):
    # Elementwise add on the VPU; python-int 1 keeps the ref's dtype (f32/bf16/...).
    o_ref[...] = x_ref[...] + 1


def _add_one_tiled(x2d):
    rows, cols = x2d.shape
    tr = min(_MAX_ROWS_PER_TILE, rows)  # rows is a multiple of 8, so tr is too
    grid = (pl.cdiv(rows, tr),)
    return pl.pallas_call(
        _add_one_kernel,
        out_shape=jax.ShapeDtypeStruct(x2d.shape, x2d.dtype),
        grid=grid,
        in_specs=[pl.BlockSpec((tr, cols), lambda i: (i, 0))],
        out_specs=pl.BlockSpec((tr, cols), lambda i: (i, 0)),
        # Reuse the (padded, intermediate) input buffer for the output.
        input_output_aliases={0: 0},
        compiler_params=pltpu.CompilerParams(
            # Independent tiles -> shard across both TCs on v7x; no-op on v5e/v6e.
            dimension_semantics=("parallel",),
            # Explicit limit sized for v7x's smaller VMEM; plenty of headroom.
            vmem_limit_bytes=32 * 1024 * 1024,
        ),
    )(x2d)


def little_nn_forward(x):
    """Pallas equivalent of littleNN.forward: output = input + 1 (dtype-preserving)."""
    x = jnp.asarray(x)
    orig_shape = x.shape
    total = x.size

    # Tiny / scalar inputs: a pallas_call launch is pure overhead — just add.
    if total < _TINY_THRESHOLD:
        return x + 1

    # Lane-dense 2-D slab: pad the flattened array to a multiple of 8 * _LANES so
    # the row dim is a multiple of 8 and the lane dim is a large multiple of 128.
    flat = x.reshape((-1,))
    chunk = 8 * _LANES
    padded_total = ((total + chunk - 1) // chunk) * chunk
    if padded_total != total:
        flat = jnp.pad(flat, (0, padded_total - total))
    x2d = flat.reshape((padded_total // _LANES, _LANES))

    out2d = _add_one_tiled(x2d)

    return out2d.reshape((-1,))[:total].reshape(orig_shape)


if __name__ == "__main__":
    key = jax.random.PRNGKey(0)

    # Kernel path: small elementwise-friendly tensor.
    x = jax.random.normal(key, (2, 4, 16, 16), dtype=jnp.float32)
    out = jax.block_until_ready(little_nn_forward(x))
    assert out.shape == x.shape, f"shape mismatch: {out.shape} vs {x.shape}"
    assert out.dtype == x.dtype, f"dtype mismatch: {out.dtype} vs {x.dtype}"
    assert jnp.allclose(out, x + 1.0), "kernel output != input + 1"

    # Original spec usage: x = tensor(1.0) -> output = 2.0 (tiny-input fast path).
    x_scalar = jnp.float32(1.0)
    out_scalar = jax.block_until_ready(little_nn_forward(x_scalar))
    assert out_scalar.shape == (), f"expected scalar output, got {out_scalar.shape}"
    assert jnp.allclose(out_scalar, jnp.float32(2.0)), f"expected 2.0, got {out_scalar}"

    print("KERNEL_OK")
</pallas_src>

<mosaic_0001>
module attributes {stable_mosaic.version = 11 : i64} {
  func.func @_add_one_kernel(%arg0: i32, %arg1: memref<8x1024xf32, #tpu.memory_space<vmem>>, %arg2: memref<8x1024xf32, #tpu.memory_space<vmem>>) attributes {dimension_semantics = [#tpu.dimension_semantics<parallel>], iteration_bounds = array<i64: 1>, scalar_prefetch = 0 : i64, scratch_operands = 0 : i64, tpu.core_type = #tpu.core_type<tc>, window_params = [{transform_indices = @transform_0, window_bounds = array<i64: 8, 1024>}, {transform_indices = @transform_1, window_bounds = array<i64: 8, 1024>}]} {
    %c0 = arith.constant 0 : index
    %c0_0 = arith.constant 0 : index
    %0 = vector.load %arg1[%c0, %c0_0] : memref<8x1024xf32, #tpu.memory_space<vmem>>, vector<8x1024xf32>
    %cst = arith.constant 1.000000e+00 : f32
    %1 = vector.broadcast %cst : f32 to vector<8x1024xf32>
    %2 = arith.addf %0, %1 : vector<8x1024xf32>
    %c0_1 = arith.constant 0 : index
    %c0_2 = arith.constant 0 : index
    %3 = vector.load %arg2[%c0_1, %c0_2] : memref<8x1024xf32, #tpu.memory_space<vmem>>, vector<8x1024xf32>
    tpu.vector_store %arg2[%c0_1, %c0_2], %2 {strides = array<i32>} : memref<8x1024xf32, #tpu.memory_space<vmem>>, vector<8x1024xf32>,
    return
  }
  func.func @transform_0(%arg0: i32) -> (i32, i32) {
    %c0_i32 = arith.constant 0 : i32
    %c0_i32_0 = arith.constant 0 : i32
    return %arg0, %c0_i32 : i32, i32
  }
  func.func @transform_1(%arg0: i32) -> (i32, i32) {
    %c0_i32 = arith.constant 0 : i32
    %c0_i32_0 = arith.constant 0 : i32
    return %arg0, %c0_i32 : i32, i32
  }
}

</mosaic_0001>

<bundles_post_ra>
// kernel: tpu_custom_call.1
= control target key start
LH: loop header
LB: loop body
LE: loop exit
PB: predicated region body
PF: predicated region fallthrough
CT: control target
= control target key end

     0   :  { %6 = vsyncpa [#allocation3], 0  ;;  %s146_s0 = inlined_call_operand.hbm [shape: f32[8,1024], index: 0, kind: input, shape index: {}, may-alias: {0,1}]   ;;  %s147_s1 = inlined_call_operand.hbm [shape: f32[8,1024], index: 1, kind: output, shape index: {}, may-alias: {0,1}]  }
   0x1   :  { %7 = vsyncpa [#allocation4], 0  ;;  %s110_s6 = smov [#allocation2]   ;;  %s62_s10 = scalar_lea.hbm %s146_s0, 1024 }
   0x2   :  { %s14_s7 = sshll.u32 %s110_s6, 4  ;;  %p63_p0 = scmp.ne.s32.totalorder %s146_s0, %s62_s10  ;;  %s15_s7 = int_to_ptr.vmem [resolvable:$true] %s14_s7 }
   0x3   :  { %p66_p1 = scmp.lt.u32.totalorder %s62_s10, %s146_s0 }
   0x5   :  { %p68_p2 = pnand %p66_p1, %p63_p0 }
   0x7   :  { %71 = shalt.err (!%p68_p2)
}
   0x8   :  { %s72_s15 = scalar_lea.vmem %s15_s7, 1024  ;;  %p77_p4 = scmp.lt.s32.totalorder %s15_s7, %s15_s7 }
   0x9   :  { %p73_p3 = scmp.ne.s32.totalorder %s15_s7, %s72_s15  ;;  %p78_p5 = scmp.lt.s32.totalorder %s72_s15, %s72_s15 }
   0xb   :  { %p79_p6 = por %p78_p5, %p77_p4 }
   0xd   :  { %p80_p7 = pnand %p79_p6, %p73_p3 }
   0xf   :  { %83 = shalt.err (!%p80_p7)
}
  0x10   :  { %17 = dma.hbm_to_vmem [thread:$0]  %s146_s0, 1024, %s15_s7, [#allocation3]  }
  0x11   :  { %106 = dma.done.wait [#allocation3], 1024  }
  0x12   :  { %107 = vsyncadd [#allocation3], 4294966272  ;;  %v21_v0 = vld [vmem:[#allocation2] sm:$0xff]  ;;  %v22_v1 = vld [vmem:[#allocation2 + $0x8] sm:$0xff]  ;;  %s111_s18 = smov [#allocation5]  }
  0x13   :  { %v23_v2 = vld [vmem:[#allocation2 + $0x10] sm:$0xff]  ;;  %s51_s19 = sshll.u32 %s111_s18, 4  ;;  %v29_v3 = vadd.f32 1.0, %v21_v0  ;;  %v30_v4 = vadd.f32 1.0, %v22_v1  ;;  %v24_v6 = vld [vmem:[#allocation2 + $0x18] sm:$0xff]  ;;  %v25_v7 = vld [vmem:[#allocation2 + $0x20] sm:$0xff]  ;;  %s52_s19 = int_to_ptr.vmem [resolvable:$true] %s51_s19 }
  0x14   :  { %v31_v5 = vadd.f32 1.0, %v23_v2  ;;  %v26_v8 = vld [vmem:[#allocation2 + $0x28] sm:$0xff]  ;;  %v32_v9 = vadd.f32 1.0, %v24_v6  ;;  %v33_v10 = vadd.f32 1.0, %v25_v7  ;;  %v27_v12 = vld [vmem:[#allocation2 + $0x30] sm:$0xff]  ;;  %v28_v13 = vld [vmem:[#allocation2 + $0x38] sm:$0xff]  ;;  %p89_p9 = scmp.lt.s32.totalorder %s52_s19, %s52_s19 }
  0x15   :  { %v34_v11 = vadd.f32 1.0, %v26_v8  ;;  %37 = vst [vmem:[#allocation5] sm:$0xff] %v29_v3  ;;  %38 = vst [vmem:[#allocation5 + $0x8] sm:$0xff] %v30_v4  ;;  %v35_v14 = vadd.f32 1.0, %v27_v12  ;;  %v36_v15 = vadd.f32 1.0, %v28_v13  ;;  %s84_s0 = scalar_lea.vmem %s52_s19, 1024 }
  0x16   :  { %39 = vst [vmem:[#allocation5 + $0x10] sm:$0xff] %v31_v5  ;;  %40 = vst [vmem:[#allocation5 + $0x18] sm:$0xff] %v32_v9  ;;  %p85_p8 = scmp.ne.s32.totalorder %s52_s19, %s84_s0  ;;  %p90_p10 = scmp.lt.s32.totalorder %s84_s0, %s84_s0 }
  0x17   :  { %41 = vst [vmem:[#allocation5 + $0x20] sm:$0xff] %v33_v10  ;;  %42 = vst [vmem:[#allocation5 + $0x28] sm:$0xff] %v34_v11 }
  0x18   :  { %43 = vst [vmem:[#allocation5 + $0x30] sm:$0xff] %v35_v14  ;;  %44 = vst [vmem:[#allocation5 + $0x38] sm:$0xff] %v36_v15  ;;  %p91_p11 = por %p90_p10, %p89_p9 }
  0x1a   :  { %p92_p12 = pnand %p91_p11, %p85_p8 }
  0x1c   :  { %95 = shalt.err (!%p92_p12)
}
  0x1d   :  { %s96_s22 = scalar_lea.hbm %s147_s1, 1024 }
  0x1e   :  { %p97_p13 = scmp.ne.s32.totalorder %s147_s1, %s96_s22  ;;  %p100_p0 = scmp.lt.u32.totalorder %s96_s22, %s147_s1 }
  0x20   :  { %p102_p1 = pnand %p100_p0, %p97_p13 }
  0x22   :  { %105 = shalt.err (!%p102_p1)
}
  0x23   :  { %54 = dma.vmem_to_hbm [thread:$0]  %s52_s19, 1024, %s147_s1, [#allocation4]  }
  0x24   :  { %108 = dma.done.wait [#allocation4], 1024  }
  0x25   :  { %109 = vsyncadd [#allocation4], 4294966272 }
  0x26   :  { %58 = vsyncpa [#allocation3], 1 }
  0x27   :  { %59 = vsyncpa [#allocation4], 1 }

</bundles_post_ra>
